<compile_context>
chip_gen: v7x
topology: tpu7x:2x2x1
jax: 0.10.0
libtpu: 0.0.40
codegen_flags: <defaults>
</compile_context>

<pallas_src>
import jax
import jax.numpy as jnp
from jax import lax
from jax.experimental import pallas as pl
from jax.experimental.pallas import tpu as pltpu

ALPHA = 0.25
GAMMA = 2.0          # gamma == 2 -> squared factor below
LANES = 128
CHUNK_ROWS = 64      # per-chunk working set fits in vregs; multiple of 8/16/32
                     # so f32 / bf16 / int8 inputs all satisfy tiling rules.


def _make_focal_kernel(tile_rows, total_valid, need_mask):
    """Builds a kernel specialized for one tile size / padding situation."""
    n_chunks = tile_rows // CHUNK_ROWS
    chunk_elems = CHUNK_ROWS * LANES

    def kernel(x_ref, t_ref, out_ref):
        if need_mask:
            # Element index within a chunk, hoisted out of the loop
            # (broadcast_in_dim is not CSE'd by JAX).
            local_idx = (
                lax.broadcasted_iota(jnp.int32, (CHUNK_ROWS, LANES), 0) * LANES
                + lax.broadcasted_iota(jnp.int32, (CHUNK_ROWS, LANES), 1))
            block_base = pl.program_id(0) * (tile_rows * LANES)

        def body(j, acc):
            row0 = pl.multiple_of(j * CHUNK_ROWS, CHUNK_ROWS)
            x = x_ref[pl.ds(row0, CHUNK_ROWS), :].astype(jnp.float32)
            t = t_ref[pl.ds(row0, CHUNK_ROWS), :].astype(jnp.float32)

            # One shared exponential: e = exp(-|x|) feeds both sigmoid(x) and
            # the numerically-stable BCE log1p term.
            e = jnp.exp(-jnp.abs(x))
            d = 1.0 + e
            r = pl.reciprocal(d, approx=True)     # EUP slot (has slack)
            r = r * (2.0 - d * r)                 # one Newton step -> ~f32 exact
            p = jnp.where(x >= 0.0, r, e * r)     # == sigmoid(x)

            # Stable BCE-with-logits (matches F.binary_cross_entropy_with_logits):
            #   ce = max(x, 0) - x*t + log1p(exp(-|x|))
            ce = jnp.maximum(x, 0.0) - x * t + jnp.log1p(e)

            # 1 - p_t == p + t - 2*p*t ; alpha_t == 0.75 - 0.5*t  (alpha = 0.25)
            one_minus_pt = p + t - 2.0 * (p * t)
            loss = (0.75 - 0.5 * t) * ce * (one_minus_pt * one_minus_pt)

            if need_mask:
                idx = block_base + j * chunk_elems + local_idx
                loss = jnp.where(idx < total_valid, loss, 0.0)

            # Fold sublane groups with cheap VPU adds -> lane-dense (8,128).
            return acc + loss.reshape(CHUNK_ROWS // 8, 8, LANES).sum(axis=0)

        acc = lax.fori_loop(0, n_chunks, body,
                            jnp.zeros((8, LANES), jnp.float32),
                            unroll=min(n_chunks, 8))
        out_ref[...] = acc

    return kernel


def _cdiv(a, b):
    return (a + b - 1) // b


def _choose_tiling(m_rows, max_tile_rows):
    """Pick (tile_rows, num_blocks), both in CHUNK_ROWS units, preferring >= 2
    blocks whenever possible (feeds both v7x TensorCores) and balancing block
    sizes so padding stays bounded by ~num_blocks chunks."""
    m_chunks = max(1, _cdiv(m_rows, CHUNK_ROWS))
    max_tile_chunks = max(1, max_tile_rows // CHUNK_ROWS)
    num_blocks = _cdiv(m_chunks, max_tile_chunks)
    if num_blocks == 1 and m_chunks >= 2:
        num_blocks = 2
    tile_chunks = _cdiv(m_chunks, num_blocks)
    return tile_chunks * CHUNK_ROWS, num_blocks


def sigmoid_focal_loss_mean(inputs, targets, *, max_tile_rows=4096):
    """inputs/targets: arbitrary-shaped logits/labels (any float dtype).
    Returns scalar mean focal loss (alpha=0.25, gamma=2.0)."""
    assert inputs.shape == targets.shape
    total = int(inputs.size)
    m_rows = _cdiv(total, LANES)

    tile_rows, num_blocks = _choose_tiling(m_rows, max_tile_rows)
    m_padded = num_blocks * tile_rows
    padded_total = m_padded * LANES
    need_mask = padded_total != total

    # Keep native dtypes: the kernel casts to f32 internally; feeding bf16/int8
    # halves/quarters HBM traffic for this memory-bound kernel.
    x_flat = inputs.reshape(-1)
    t_flat = targets.reshape(-1)
    if need_mask:
        pad = padded_total - total
        x_flat = jnp.pad(x_flat, (0, pad))
        t_flat = jnp.pad(t_flat, (0, pad))
    x2 = x_flat.reshape(m_padded, LANES)
    t2 = t_flat.reshape(m_padded, LANES)

    kernel = _make_focal_kernel(tile_rows, total, need_mask)

    partials = pl.pallas_call(
        kernel,
        out_shape=jax.ShapeDtypeStruct((num_blocks * 8, LANES), jnp.float32),
        grid_spec=pltpu.PrefetchScalarGridSpec(
            num_scalar_prefetch=0,
            grid=(num_blocks,),
            in_specs=[
                pl.BlockSpec((tile_rows, LANES), lambda i: (i, 0)),
                pl.BlockSpec((tile_rows, LANES), lambda i: (i, 0)),
            ],
            out_specs=pl.BlockSpec((8, LANES), lambda i: (i, 0)),
        ),
        compiler_params=pltpu.CompilerParams(
            # Independent partial-sum blocks -> fully parallel grid
            # (lets both v7x TensorCores participate; harmless on v5e/v6e).
            dimension_semantics=("parallel",),
            # Explicit budget: worst case ~8 MiB of double-buffered inputs at
            # tile_rows=4096 f32; 32 MiB is safe on v5e/v6e/v7x.
            vmem_limit_bytes=32 * 1024 * 1024,
        ),
    )(x2, t2)

    # Tiny final reduction + mean (over the TRUE element count) in plain JAX.
    return jnp.sum(partials) / jnp.float32(total)
    # TODO(synk): reduction='none'/'sum' variants of the module are not exposed;
    # 'sum' is jnp.sum(partials), 'none' would need a full-size output.


def _reference(inputs, targets, alpha=ALPHA, gamma=GAMMA):
    x = inputs.astype(jnp.float32)
    t = targets.astype(jnp.float32)
    p = jax.nn.sigmoid(x)
    ce = jnp.maximum(x, 0.0) - x * t + jnp.log1p(jnp.exp(-jnp.abs(x)))
    p_t = p * t + (1.0 - p) * (1.0 - t)
    loss = ce * (1.0 - p_t) ** gamma
    alpha_t = alpha * t + (1.0 - alpha) * (1.0 - t)
    loss = alpha_t * loss
    return jnp.mean(loss)


if __name__ == "__main__":
    key = jax.random.PRNGKey(0)
    k1, k2 = jax.random.split(key)

    # NCHW-style logits, small shape: batch=2, channels=4, spatial=16x16
    x = jax.random.normal(k1, (2, 4, 16, 16), dtype=jnp.float32) * 2.0
    targets = jax.random.bernoulli(k2, p=0.3, shape=(2, 4, 16, 16)).astype(jnp.float32)

    loss = sigmoid_focal_loss_mean(x, targets)
    loss = jax.block_until_ready(loss)

    ref = _reference(x, targets)
    assert jnp.allclose(loss, ref, rtol=1e-5, atol=1e-6), (loss, ref)
    print("KERNEL_OK")
</pallas_src>

<mosaic_0001>
module attributes {stable_mosaic.version = 11 : i64} {
  func.func @kernel(%arg0: i32, %arg1: memref<64x128xf32, #tpu.memory_space<vmem>>, %arg2: memref<64x128xf32, #tpu.memory_space<vmem>>, %arg3: memref<8x128xf32, #tpu.memory_space<vmem>>) attributes {dimension_semantics = [#tpu.dimension_semantics<parallel>], iteration_bounds = array<i64: 1>, scalar_prefetch = 0 : i64, scratch_operands = 0 : i64, tpu.core_type = #tpu.core_type<tc>, window_params = [{transform_indices = @transform_0, window_bounds = array<i64: 64, 128>}, {transform_indices = @transform_1, window_bounds = array<i64: 64, 128>}, {transform_indices = @transform_2, window_bounds = array<i64: 8, 128>}]} {
    %0 = tpu.iota {dimensions = array<i32: 0>} : vector<64x128xi32>
    %c128_i32 = arith.constant 128 : i32
    %1 = vector.broadcast %c128_i32 : i32 to vector<64x128xi32>
    %2 = arith.muli %0, %1 : vector<64x128xi32>
    %3 = tpu.iota {dimensions = array<i32: 1>} : vector<64x128xi32>
    %4 = arith.addi %2, %3 : vector<64x128xi32>
    %c8192_i32 = arith.constant 8192 : i32
    %5 = arith.muli %arg0, %c8192_i32 : i32
    %cst = arith.constant 0.000000e+00 : f32
    %6 = vector.broadcast %cst : f32 to vector<8x128xf32>
    %c0_i32 = arith.constant 0 : i32
    %c64_i32 = arith.constant 64 : i32
    %7 = arith.muli %c0_i32, %c64_i32 : i32
    %8 = tpu.assume_multiple %7, 64 : i32
    %9 = arith.index_cast %8 : i32 to index
    %c0 = arith.constant 0 : index
    %10 = vector.load %arg1[%9, %c0] : memref<64x128xf32, #tpu.memory_space<vmem>>, vector<64x128xf32>
    %11 = arith.index_cast %8 : i32 to index
    %c0_0 = arith.constant 0 : index
    %12 = vector.load %arg2[%11, %c0_0] : memref<64x128xf32, #tpu.memory_space<vmem>>, vector<64x128xf32>
    %13 = math.absf %10 : vector<64x128xf32>
    %cst_1 = arith.constant 0.000000e+00 : f32
    %14 = vector.broadcast %cst_1 : f32 to vector<64x128xf32>
    %15 = arith.subf %14, %13 : vector<64x128xf32>
    %16 = math.exp %15 : vector<64x128xf32>
    %cst_2 = arith.constant 1.000000e+00 : f32
    %17 = vector.broadcast %cst_2 : f32 to vector<64x128xf32>
    %18 = arith.addf %17, %16 : vector<64x128xf32>
    %19 = tpu.reciprocal %18 {approx = true} : vector<64x128xf32> -> vector<64x128xf32>
    %20 = arith.mulf %18, %19 : vector<64x128xf32>
    %cst_3 = arith.constant 2.000000e+00 : f32
    %21 = vector.broadcast %cst_3 : f32 to vector<64x128xf32>
    %22 = arith.subf %21, %20 : vector<64x128xf32>
    %23 = arith.mulf %19, %22 : vector<64x128xf32>
    %cst_4 = arith.constant 0.000000e+00 : f32
    %24 = vector.broadcast %cst_4 : f32 to vector<64x128xf32>
    %25 = arith.cmpf oge, %10, %24 : vector<64x128xf32>
    %26 = arith.mulf %16, %23 : vector<64x128xf32>
    %27 = arith.select %25, %23, %26 : vector<64x128xi1>, vector<64x128xf32>
    %cst_5 = arith.constant 0.000000e+00 : f32
    %28 = vector.broadcast %cst_5 : f32 to vector<64x128xf32>
    %29 = arith.maximumf %10, %28 : vector<64x128xf32>
    %30 = arith.mulf %10, %12 : vector<64x128xf32>
    %31 = arith.subf %29, %30 : vector<64x128xf32>
    %32 = math.log1p %16 : vector<64x128xf32>
    %33 = arith.addf %31, %32 : vector<64x128xf32>
    %34 = arith.addf %27, %12 : vector<64x128xf32>
    %35 = arith.mulf %27, %12 : vector<64x128xf32>
    %cst_6 = arith.constant 2.000000e+00 : f32
    %36 = vector.broadcast %cst_6 : f32 to vector<64x128xf32>
    %37 = arith.mulf %36, %35 : vector<64x128xf32>
    %38 = arith.subf %34, %37 : vector<64x128xf32>
    %cst_7 = arith.constant 5.000000e-01 : f32
    %39 = vector.broadcast %cst_7 : f32 to vector<64x128xf32>
    %40 = arith.mulf %39, %12 : vector<64x128xf32>
    %cst_8 = arith.constant 7.500000e-01 : f32
    %41 = vector.broadcast %cst_8 : f32 to vector<64x128xf32>
    %42 = arith.subf %41, %40 : vector<64x128xf32>
    %43 = arith.mulf %42, %33 : vector<64x128xf32>
    %44 = arith.mulf %38, %38 : vector<64x128xf32>
    %45 = arith.mulf %43, %44 : vector<64x128xf32>
    %c8192_i32_9 = arith.constant 8192 : i32
    %46 = arith.muli %c0_i32, %c8192_i32_9 : i32
    %47 = arith.addi %5, %46 : i32
    %48 = vector.broadcast %47 : i32 to vector<64x128xi32>
    %49 = arith.addi %48, %4 : vector<64x128xi32>
    %c2048_i32 = arith.constant 2048 : i32
    %50 = vector.broadcast %c2048_i32 : i32 to vector<64x128xi32>
    %51 = arith.cmpi slt, %49, %50 : vector<64x128xi32>
    %cst_10 = arith.constant 0.000000e+00 : f32
    %52 = vector.broadcast %cst_10 : f32 to vector<64x128xf32>
    %53 = arith.select %51, %45, %52 : vector<64x128xi1>, vector<64x128xf32>
    %54 = vector.shape_cast %53 : vector<64x128xf32> to vector<8x8x128xf32>
    %cst_11 = arith.constant dense<0.000000e+00> : vector<8x128xf32>
    %55 = vector.multi_reduction <add>, %54, %cst_11 [0] : vector<8x8x128xf32> to vector<8x128xf32>
    %56 = arith.addf %6, %55 : vector<8x128xf32>
    %c1_i32 = arith.constant 1 : i32
    %c0_12 = arith.constant 0 : index
    %c0_13 = arith.constant 0 : index
    %57 = vector.load %arg3[%c0_12, %c0_13] : memref<8x128xf32, #tpu.memory_space<vmem>>, vector<8x128xf32>
    tpu.vector_store %arg3[%c0_12, %c0_13], %56 {strides = array<i32>} : memref<8x128xf32, #tpu.memory_space<vmem>>, vector<8x128xf32>,
    return
  }
  func.func @transform_0(%arg0: i32) -> (i32, i32) {
    %c0_i32 = arith.constant 0 : i32
    %c0_i32_0 = arith.constant 0 : i32
    return %arg0, %c0_i32 : i32, i32
  }
  func.func @transform_1(%arg0: i32) -> (i32, i32) {
    %c0_i32 = arith.constant 0 : i32
    %c0_i32_0 = arith.constant 0 : i32
    return %arg0, %c0_i32 : i32, i32
  }
  func.func @transform_2(%arg0: i32) -> (i32, i32) {
    %c0_i32 = arith.constant 0 : i32
    %c0_i32_0 = arith.constant 0 : i32
    return %arg0, %c0_i32 : i32, i32
  }
}

</mosaic_0001>

<bundles_post_ra>
// kernel: tpu_custom_call.1
= control target key start
LH: loop header
LB: loop body
LE: loop exit
PB: predicated region body
PF: predicated region fallthrough
CT: control target
= control target key end

     0   :  { %7 = vsyncpa [#allocation3], 0  ;;  %s910_s0 = inlined_call_operand.hbm [shape: f32[64,128], index: 0, kind: input, shape index: {}]   ;;  %s911_s1 = inlined_call_operand.hbm [shape: f32[64,128], index: 1, kind: input, shape index: {}]   ;;  %s912_s2 = inlined_call_operand.hbm [shape: f32[8,128], index: 2, kind: output, shape index: {}]  }
   0x1   :  { %8 = vsyncpa [#allocation6], 0 }
   0x2   :  { %9 = vsyncpa [#allocation4], 0  ;;  %s531_s9 = smov [#allocation2]   ;;  %s459_s13 = scalar_lea.hbm %s910_s0, 1024 }
   0x3   :  { %s15_s10 = sshll.u32 %s531_s9, 4  ;;  %p460_p0 = scmp.ne.s32.totalorder %s910_s0, %s459_s13  ;;  %s16_s10 = int_to_ptr.vmem [resolvable:$true] %s15_s10 }
   0x4   :  { %p463_p1 = scmp.lt.u32.totalorder %s459_s13, %s910_s0 }
   0x6   :  { %p465_p2 = pnand %p463_p1, %p460_p0 }
   0x8   :  { %468 = shalt.err (!%p465_p2)
}
   0x9   :  { %s469_s18 = scalar_lea.vmem %s16_s10, 1024  ;;  %p474_p4 = scmp.lt.s32.totalorder %s16_s10, %s16_s10 }
   0xa   :  { %p470_p3 = scmp.ne.s32.totalorder %s16_s10, %s469_s18  ;;  %p475_p5 = scmp.lt.s32.totalorder %s469_s18, %s469_s18 }
   0xc   :  { %p476_p6 = por %p475_p5, %p474_p4 }
   0xe   :  { %p477_p7 = pnand %p476_p6, %p470_p3 }
  0x10   :  { %480 = shalt.err (!%p477_p7)
}
  0x11   :  { %s532_s19 = smov 128   ;;  %s533_s20 = smov 8  }
  0x12   :  { %21 = dma.hbm_to_vmem [thread:$0]  %s910_s0, 1024, %s16_s10, [#allocation3], %s532_s19, %s532_s19, %s533_s20  }
  0x13   :  { %s534_s23 = smov [#allocation5]   ;;  %s481_s27 = scalar_lea.hbm %s911_s1, 1024 }
  0x14   :  { %s27_s24 = sshll.u32 %s534_s23, 4  ;;  %p482_p8 = scmp.ne.s32.totalorder %s911_s1, %s481_s27  ;;  %s28_s24 = int_to_ptr.vmem [resolvable:$true] %s27_s24 }
  0x15   :  { %p485_p9 = scmp.lt.u32.totalorder %s481_s27, %s911_s1 }
  0x17   :  { %p487_p10 = pnand %p485_p9, %p482_p8 }
  0x19   :  { %490 = shalt.err (!%p487_p10)
}
  0x1a   :  { %s491_s4 = scalar_lea.vmem %s28_s24, 1024  ;;  %p496_p12 = scmp.lt.s32.totalorder %s28_s24, %s28_s24 }
  0x1b   :  { %p492_p11 = scmp.ne.s32.totalorder %s28_s24, %s491_s4  ;;  %p497_p13 = scmp.lt.s32.totalorder %s491_s4, %s491_s4 }
  0x1d   :  { %p498_p0 = por %p497_p13, %p496_p12 }
  0x1f   :  { %p499_p1 = pnand %p498_p0, %p492_p11 }
  0x21   :  { %502 = shalt.err (!%p499_p1)
}
  0x22   :  { %33 = dma.hbm_to_vmem [thread:$0]  %s911_s1, 1024, %s28_s24, [#allocation6], %s532_s19, %s532_s19, %s533_s20  }
  0x23   :  { %525 = dma.done.wait [#allocation3], 1024  }
  0x24   :  { %526 = vsyncadd [#allocation3], 4294966272 }
  0x25   :  { %527 = dma.done.wait [#allocation6], 1024  }
  0x26   :  { %528 = vsyncadd [#allocation6], 4294966272  ;;  %v40_v0 = vlaneseq  ;;  %v575_v2 = vld [vmem:[#allocation2] sm:$0xff]  ;;  %v577_v3 = vld [vmem:[#allocation2 + $0x8] sm:$0xff]  ;;  %s535_s1 = smov [#allocation7]  }
  0x27   :  { %v579_v4 = vld [vmem:[#allocation2 + $0x10] sm:$0xff]  ;;  %v583_v6 = vld [vmem:[#allocation2 + $0x18] sm:$0xff]  ;;  %v585_v7 = vld [vmem:[#allocation2 + $0x20] sm:$0xff]  ;;  %v84_v8 = vand.u32 2147483647, %v575_v2  ;;  %vm156_vm0 = vcmp.ge.f32.partialorder %v575_v2, 0.0 }
  0x28   :  { %v41_v1 = vshrl.u32 %v40_v0, 7  ;;  %v581_v5 = vand.u32 127, %v40_v0  ;;  %v588_v10 = vld [vmem:[#allocation2 + $0x28] sm:$0xff]  ;;  %v590_v11 = vld [vmem:[#allocation2 + $0x30] sm:$0xff]  ;;  %v592_v12 = vld [vmem:[#allocation2 + $0x38] sm:$0xff]  ;;  %vm157_vm1 = vcmp.ge.f32.partialorder %v577_v3, 0.0 }
  0x29   :  { %v85_v13 = vand.u32 2147483647, %v577_v3  ;;  %v86_v16 = vand.u32 2147483647, %v579_v4  ;;  %v92_v17 = vsub.f32 0.0, %v84_v8  ;;  %v607_v47 = vld [vmem:[#allocation5] sm:$0xff] }
  0x2a   :  { %934 = vst [vmem:[#allocation11_spill] sm:$0xff] %v581_v5  ;;  %v42_v9 = vadd.s32 8, %v41_v1  ;;  %v43_v14 = vadd.s32 16, %v41_v1  ;;  %v44_v15 = vadd.s32 24, %v41_v1  ;;  %v45_v18 = vadd.s32 32, %v41_v1  ;;  %938 = vst [vmem:[#allocation15_spill] sm:$0xff] %v607_v47 }
  0x2b   :  { %v87_v19 = vand.u32 2147483647, %v583_v6  ;;  %v88_v20 = vand.u32 2147483647, %v585_v7  ;;  %v93_v21 = vsub.f32 0.0, %v85_v13  ;;  %v94_v25 = vsub.f32 0.0, %v86_v16 }
  0x2c   :  { %v89_v22 = vand.u32 2147483647, %v588_v10  ;;  %v90_v23 = vand.u32 2147483647, %v590_v11  ;;  %v91_v24 = vand.u32 2147483647, %v592_v12  ;;  %v188_v60 = vmul.f32 %v607_v47, %v575_v2 }
  0x2d   :  { %v95_v26 = vsub.f32 0.0, %v87_v19  ;;  %v96_v27 = vsub.f32 0.0, %v88_v20  ;;  %v100_v28 = vmul.f32 1.442695, %v92_v17  ;;  %v102_v32 = vmul.f32 1.442695, %v93_v21 }
  0x2e   :  { %v97_v29 = vsub.f32 0.0, %v89_v22  ;;  %v98_v30 = vsub.f32 0.0, %v90_v23  ;;  %v99_v31 = vsub.f32 0.0, %v91_v24  ;;  %v104_v33 = vmul.f32 1.442695, %v94_v25  ;;  %v609_v48 = vld [vmem:[#allocation5 + $0x8] sm:$0xff] }
  0x2f   :  { %411 = vpow2.f32 %v100_v28  ;;  %v106_v34 = vmul.f32 1.442695, %v95_v26  ;;  %v108_v35 = vmul.f32 1.442695, %v96_v27  ;;  %v601_v36 = vadd.s32 40, %v41_v1  ;;  %939 = vst [vmem:[#allocation16_spill] sm:$0xff] %v609_v48 }
  0x30   :  { %v603_v37 = vadd.s32 48, %v41_v1  ;;  %413 = vpow2.f32 %v102_v32  ;;  %v110_v38 = vmul.f32 1.442695, %v97_v29  ;;  %v605_v39 = vadd.s32 56, %v41_v1  ;;  %v616_v52 = vld [vmem:[#allocation5 + $0x10] sm:$0xff]  ;;  %v631_v58 = vld [vmem:[#allocation5 + $0x18] sm:$0xff] }
  0x31   :  { %935 = vst [vmem:[#allocation12_spill] sm:$0xff] %v601_v36  ;;  %v49_v40 = vmul.u32 128, %v41_v1  ;;  %415 = vpow2.f32 %v104_v33  ;;  %v112_v41 = vmul.f32 1.442695, %v98_v30  ;;  %v50_v42 = vmul.u32 128, %v42_v9  ;;  %941 = vst [vmem:[#allocation18_spill] sm:$0xff] %v616_v52 }
  0x32   :  { %936 = vst [vmem:[#allocation13_spill] sm:$0xff] %v603_v37  ;;  %937 = vst [vmem:[#allocation14_spill] sm:$0xff] %v605_v39  ;;  %v51_v43 = vmul.u32 128, %v43_v14  ;;  %417 = vpow2.f32 %v106_v34  ;;  %v114_v44 = vmul.f32 1.442695, %v99_v31  ;;  %v52_v45 = vmul.u32 128, %v44_v15 }
  0x33   :  { %v53_v46 = vmul.u32 128, %v45_v18  ;;  %419 = vpow2.f32 %v108_v35  ;;  %v614_v51 = vadd.s32 %v581_v5, %v49_v40  ;;  %v620_v54 = vadd.s32 %v581_v5, %v50_v42  ;;  %946 = vst [vmem:[#allocation23_spill] sm:$0xff] %v631_v58  ;;  %v633_v59 = vld [vmem:[#allocation5 + $0x20] sm:$0xff]  ;;  %v639_v62 = vld [vmem:[#allocation5 + $0x28] sm:$0xff]  ;;  %v641_v63 = vld [vmem:[#allocation5 + $0x30] sm:$0xff]  ;;  %s396_s6 = sshll.u32 %s535_s1, 4  ;;  %s397_s6 = int_to_ptr.vmem [resolvable:$true] %s396_s6 }
  0x34   :  { %421 = vpow2.f32 %v110_v38  ;;  %v623_v55 = vadd.s32 %v581_v5, %v51_v43  ;;  %v626_v56 = vadd.s32 %v581_v5, %v52_v45  ;;  %947 = vst [vmem:[#allocation24_spill] sm:$0xff] %v633_v59  ;;  %v189_v61 = vmul.f32 %v609_v48, %v577_v3  ;;  %948 = vst [vmem:[#allocation25_spill] sm:$0xff] %v639_v62  ;;  %v643_v0 = vld [vmem:[#allocation5 + $0x38] sm:$0xff]  ;;  %s503_s7 = scalar_lea.vmem %s397_s6, 128  ;;  %p508_p3 = scmp.lt.s32.totalorder %s397_s6, %s397_s6 }
  0x35   :  { %940 = vst [vmem:[#allocation17_spill] sm:$0xff] %v614_v51  ;;  %423 = vpow2.f32 %v112_v41  ;;  %942 = vst [vmem:[#allocation19_spill] sm:$0xff] %v620_v54  ;;  %v629_v57 = vadd.s32 %v581_v5, %v53_v46  ;;  %v180_v1 = vmax.f32 %v575_v2, 0.0  ;;  %v181_v8 = vmax.f32 %v577_v3, 0.0  ;;  %p504_p2 = scmp.ne.s32.totalorder %s397_s6, %s503_s7  ;;  %p509_p4 = scmp.lt.s32.totalorder %s503_s7, %s503_s7 }
  0x36   :  { %943 = vst [vmem:[#allocation20_spill] sm:$0xff] %v623_v55  ;;  %425 = vpow2.f32 %v114_v44  ;;  %944 = vst [vmem:[#allocation21_spill] sm:$0xff] %v626_v56  ;;  %v182_v9 = vmax.f32 %v579_v4, 0.0  ;;  %v190_v13 = vmul.f32 %v616_v52, %v579_v4  ;;  %v183_v15 = vmax.f32 %v583_v6, 0.0 }
  0x37   :  { %945 = vst [vmem:[#allocation22_spill] sm:$0xff] %v629_v57  ;;  %949 = vst [vmem:[#allocation26_spill] sm:$0xff] %v641_v63  ;;  %v184_v16 = vmax.f32 %v585_v7, 0.0  ;;  %v185_v17 = vmax.f32 %v588_v10, 0.0  ;;  %v186_v18 = vmax.f32 %v590_v11, 0.0  ;;  %v187_v21 = vmax.f32 %v592_v12, 0.0  ;;  %p510_p5 = por %p509_p4, %p508_p3 }
  0x38   :  { %950 = vst [vmem:[#allocation27_spill] sm:$0xff] %v643_v0  ;;  %v191_v22 = vmul.f32 %v631_v58, %v583_v6  ;;  %v192_v23 = vmul.f32 %v633_v59, %v585_v7  ;;  %v193_v26 = vmul.f32 %v639_v62, %v588_v10  ;;  %v194_v27 = vmul.f32 %v641_v63, %v590_v11 }
  0x39   :  { %v650_v14 = vpop.eup %411  ;;  %v195_v28 = vmul.f32 %v643_v0, %v592_v12  ;;  %v676_v31 = vsub.f32 %v180_v1, %v188_v60  ;;  %v678_v32 = vsub.f32 %v181_v8, %v189_v61  ;;  %v683_v35 = vsub.f32 %v182_v9, %v190_v13  ;;  %p511_p6 = pnand %p510_p5, %p504_p2 }
  0x3a   :  { %v656_v19 = vpop.eup %413  ;;  %v116_v20 = vadd.f32 1.0, %v650_v14  ;;  %v207_v38 = vmul.f32 -0.5, %v650_v14  ;;  %v689_v42 = vsub.f32 %v183_v15, %v191_v22  ;;  %v695_v46 = vsub.f32 %v184_v16, %v192_v23 }
  0x3b   :  { %v664_v24 = vpop.eup %415  ;;  %v117_v25 = vadd.f32 1.0, %v656_v19  ;;  %v216_v43 = vmul.f32 -0.5, %v656_v19  ;;  %v703_v8 = vsub.f32 %v185_v17, %v193_v26  ;;  %v709_v15 = vsub.f32 %v186_v18, %v194_v27 }
  0x3c   :  { %v673_v29 = vpop.eup %417  ;;  %v118_v30 = vadd.f32 1.0, %v664_v24  ;;  %427 = vrcp.f32 %v116_v20  ;;  %951 = vst [vmem:[#allocation28_spill] sm:$0xff] %v695_v46  ;;  %v225_v60 = vmul.f32 -0.5, %v664_v24  ;;  %v208_v16 = vadd.f32 1.0, %v207_v38 }
  0x3d   :  { %v680_v33 = vpop.eup %419  ;;  %v119_v34 = vadd.f32 1.0, %v673_v29  ;;  %429 = vrcp.f32 %v117_v25  ;;  %952 = vst [vmem:[#allocation29_spill] sm:$0xff] %v703_v8  ;;  %v234_v9 = vmul.f32 -0.5, %v673_v29  ;;  %953 = vst [vmem:[#allocation30_spill] sm:$0xff] %v709_v15  ;;  %v712_v22 = vsub.f32 %v187_v21, %v195_v28 }
  0x3e   :  { %v686_v40 = vpop.eup %421  ;;  %v120_v41 = vadd.f32 1.0, %v680_v33  ;;  %431 = vrcp.f32 %v118_v30  ;;  %v217_v23 = vadd.f32 1.0, %v216_v43  ;;  %v715_v53 = vmul.f32 0.5, %v607_v47 }
  0x3f   :  { %v692_v44 = vpop.eup %423  ;;  %v121_v45 = vadd.f32 1.0, %v686_v40  ;;  %433 = vrcp.f32 %v119_v34  ;;  %954 = vst [vmem:[#allocation31_spill] sm:$0xff] %v712_v22  ;;  %v210_v17 = vand.u32 2147483647, %v650_v14  ;;  %v226_v26 = vadd.f32 1.0, %v225_v60 }
  0x40   :  { %v698_v61 = vpop.eup %425  ;;  %v701_v1 = vadd.f32 1.0, %v692_v44  ;;  %435 = vrcp.f32 %v120_v41  ;;  %955 = vst [vmem:[#allocation32_spill] sm:$0xff] %v715_v53  ;;  %v720_v50 = vmul.f32 0.5, %v609_v48  ;;  %v219_v18 = vand.u32 2147483647, %v656_v19 }
  0x41   :  { %v707_v13 = vadd.f32 1.0, %v698_v61  ;;  %437 = vrcp.f32 %v121_v45  ;;  %v235_v27 = vadd.f32 1.0, %v234_v9  ;;  %v724_v38 = vmul.f32 0.5, %v616_v52 }
  0x42   :  { %439 = vrcp.f32 %v701_v1  ;;  %956 = vst [vmem:[#allocation33_spill] sm:$0xff] %v720_v50  ;;  %v727_v21 = vmul.f32 %v650_v14, %v208_v16  ;;  %v243_v28 = vmul.f32 -0.5, %v680_v33  ;;  %v731_v43 = vmul.f32 0.5, %v631_v58 }
  0x43   :  { %441 = vrcp.f32 %v707_v13  ;;  %957 = vst [vmem:[#allocation34_spill] sm:$0xff] %v724_v38  ;;  %v734_v49 = vmul.f32 %v656_v19, %v217_v23  ;;  %v228_v39 = vand.u32 2147483647, %v664_v24  ;;  %v237_v9 = vand.u32 2147483647, %v673_v29 }
  0x44   :  { %443 = vlog2.f32 %v116_v20  ;;  %958 = vst [vmem:[#allocation35_spill] sm:$0xff] %v731_v43  ;;  %v739_v16 = vmul.f32 %v664_v24, %v226_v26  ;;  %v252_v56 = vmul.f32 -0.5, %v686_v40  ;;  %v743_v55 = vmul.f32 %v673_v29, %v235_v27 }
  0x45   :  { %445 = vlog2.f32 %v117_v25  ;;  %v246_v23 = vand.u32 2147483647, %v680_v33  ;;  %v244_v43 = vadd.f32 1.0, %v243_v28  ;;  %vm158_vm2 = vcmp.ge.f32.partialorder %v579_v4, 0.0 }
  0x46   :  { %v428_v60 = vpop.eup %427  ;;  %447 = vlog2.f32 %v118_v30  ;;  %v253_v0 = vadd.f32 1.0, %v252_v56  ;;  %vm159_vm3 = vcmp.ge.f32.partialorder %v583_v6, 0.0  ;;  %vm160_vm4 = vcmp.ge.f32.partialorder %v585_v7, 0.0 }
  0x47   :  { %v430_v57 = vpop.eup %429  ;;  %v132_v37 = vmul.f32 %v428_v60, %v116_v20  ;;  %449 = vlog2.f32 %v119_v34  ;;  %vm757_vm5 = vcmp.lt.f32.partialorder %v210_v17, 0.0004427343  ;;  %vm761_vm6 = vcmp.lt.f32.partialorder %v219_v18, 0.0004427343 }
  0x48   :  { %v432_v5 = vpop.eup %431  ;;  %v133_v36 = vmul.f32 %v430_v57, %v117_v25  ;;  %451 = vlog2.f32 %v120_v41  ;;  %v261_v25 = vmul.f32 -0.5, %v692_v44  ;;  %vm765_vm7 = vcmp.lt.f32.partialorder %v228_v39, 0.0004427343 }
  0x49   :  { %v434_v54 = vpop.eup %433  ;;  %v134_v51 = vmul.f32 %v432_v5, %v118_v30  ;;  %v140_v22 = vsub.f32 2.0, %v132_v37  ;;  %453 = vlog2.f32 %v121_v45  ;;  %v255_v30 = vand.u32 2147483647, %v686_v40 }
  0x4a   :  { %v436_v20 = vpop.eup %435  ;;  %v135_v38 = vmul.f32 %v434_v54, %v119_v34  ;;  %v141_v26 = vsub.f32 2.0, %v133_v36  ;;  %455 = vlog2.f32 %v701_v1  ;;  %v270_v36 = vmul.f32 -0.5, %v698_v61 }
  0x4b   :  { %v438_v50 = vpop.eup %437  ;;  %v136_v27 = vmul.f32 %v436_v20, %v120_v41  ;;  %v142_v53 = vsub.f32 2.0, %v134_v51  ;;  %457 = vlog2.f32 %v707_v13  ;;  %v148_v56 = vmul.f32 %v428_v60, %v140_v22 }
  0x4c   :  { %v440_v37 = vpop.eup %439  ;;  %v137_v28 = vmul.f32 %v438_v50, %v121_v45  ;;  %v143_v63 = vsub.f32 2.0, %v135_v38  ;;  %vm769_vm8 = vcmp.lt.f32.partialorder %v237_v9, 0.0004427343  ;;  %v149_v60 = vmul.f32 %v430_v57, %v141_v26  ;;  %v976_v38 = vld [vmem:[#allocation29_spill] sm:$0xff]  ;;  %v981_v26 = vld [vmem:[#allocation23_spill] sm:$0xff] }
  0x4d   :  { %v442_v34 = vpop.eup %441  ;;  %v138_v51 = vmul.f32 %v440_v37, %v701_v1  ;;  %v144_v41 = vsub.f32 2.0, %v136_v27  ;;  %v264_v1 = vand.u32 2147483647, %v692_v44  ;;  %vm161_vm9 = vcmp.ge.f32.partialorder %v588_v10, 0.0 }
  0x4e   :  { %v444_v27 = vpop.eup %443  ;;  %v139_v22 = vmul.f32 %v442_v34, %v707_v13  ;;  %v145_v17 = vsub.f32 2.0, %v137_v28  ;;  %vm776_vm10 = vcmp.lt.f32.partialorder %v246_v23, 0.0004427343  ;;  %v262_v39 = vadd.f32 1.0, %v261_v25 }
  0x4f   :  { %v446_v58 = vpop.eup %445  ;;  %v146_v52 = vsub.f32 2.0, %v138_v51  ;;  %v150_v9 = vmul.f32 %v432_v5, %v142_v53  ;;  %v151_v15 = vmul.f32 %v434_v54, %v143_v63  ;;  %v152_v48 = vmul.f32 %v436_v20, %v144_v41 }
  0x50   :  { %vm162_vm11 = vcmp.ge.f32.partialorder %v590_v11, 0.0  ;;  %vm163_vm12 = vcmp.ge.f32.partialorder %v592_v12, 0.0  ;;  %v448_v47 = vpop.eup %447  ;;  %v147_v13 = vsub.f32 2.0, %v139_v22  ;;  %v245_v57 = vmul.f32 %v680_v33, %v244_v43  ;;  %v975_v11 = vld [vmem:[#allocation28_spill] sm:$0xff] }
  0x51   :  { %vm783_vm13 = vcmp.lt.f32.partialorder %v255_v30, 0.0004427343  ;;  %v271_v23 = vadd.f32 1.0, %v270_v36  ;;  %v450_v28 = vpop.eup %449  ;;  %v153_v25 = vmul.f32 %v438_v50, %v145_v17  ;;  %v164_v51 = vmul.f32 %v650_v14, %v148_v56 }
  0x52   :  { %v254_v5 = vmul.f32 %v686_v40, %v253_v0  ;;  %vm789_vm14 = vcmp.lt.f32.partialorder %v264_v1, 0.0004427343  ;;  %v452_v54 = vpop.eup %451  ;;  %v154_v63 = vmul.f32 %v440_v37, %v146_v52  ;;  %v155_v20 = vmul.f32 %v442_v34, %v147_v13 }
  0x53   :  { %v165_v43 = vmul.f32 %v656_v19, %v149_v60  ;;  %v263_v30 = vmul.f32 %v692_v44, %v262_v39  ;;  %v454_v41 = vpop.eup %453  ;;  %v166_v36 = vmul.f32 %v664_v24, %v150_v9  ;;  %v167_v50 = vmul.f32 %v673_v29, %v151_v15  ;;  %v978_v39 = vld [vmem:[#allocation16_spill] sm:$0xff] }
  0x54   :  { %v168_v14 = vmul.f32 %v680_v33, %v152_v48  ;;  %v206_v22 = vmul.f32 0.6931472, %v444_v27  ;;  %v456_v0 = vpop.eup %455  ;;  %v215_v1 = vmul.f32 0.6931472, %v446_v58  ;;  %v224_v17 = vmul.f32 0.6931472, %v448_v47 }
  0x55   :  { %v233_v8 = vmul.f32 0.6931472, %v450_v28  ;;  %v799_v46 = vmul.f32 %v698_v61, %v271_v23  ;;  %v169_v52 = vmul.f32 %v686_v40, %v153_v25  ;;  %v172_v19 = vsel %vm156_vm0, %v148_v56, %v164_v51  ;;  %v458_v24 = vpop.eup %457  ;;  %v982_v28 = vld [vmem:[#allocation24_spill] sm:$0xff]  ;;  %v983_v51 = vld [vmem:[#allocation25_spill] sm:$0xff] }
  0x56   :  { %v242_v37 = vmul.f32 0.6931472, %v452_v54  ;;  %v251_v34 = vmul.f32 0.6931472, %v454_v41  ;;  %v170_v29 = vmul.f32 %v692_v44, %v154_v63  ;;  %v171_v33 = vmul.f32 %v698_v61, %v155_v20 }
  0x57   :  { %v173_v58 = vsel %vm157_vm1, %v149_v60, %v165_v43  ;;  %v260_v47 = vmul.f32 0.6931472, %v456_v0  ;;  %v174_v27 = vsel %vm158_vm2, %v150_v9, %v166_v36  ;;  %v175_v40 = vsel %vm159_vm3, %v151_v15, %v167_v50  ;;  %v977_v60 = vld [vmem:[#allocation15_spill] sm:$0xff]  ;;  %v984_v50 = vld [vmem:[#allocation26_spill] sm:$0xff] }
  0x58   :  { %v176_v2 = vsel %vm160_vm4, %v152_v48, %v168_v14  ;;  %v273_v56 = vand.u32 2147483647, %v698_v61  ;;  %v212_v44 = vsel %vm757_vm5, %v727_v21, %v206_v22  ;;  %v221_v3 = vsel %vm761_vm6, %v734_v49, %v215_v1  ;;  %v985_v22 = vld [vmem:[#allocation27_spill] sm:$0xff] }
  0x59   :  { %v230_v4 = vsel %vm765_vm7, %v739_v16, %v224_v17  ;;  %v239_v6 = vsel %vm769_vm8, %v743_v55, %v233_v8  ;;  %v177_v7 = vsel %vm161_vm9, %v153_v25, %v169_v52  ;;  %v248_v48 = vsel %vm776_vm10, %v245_v57, %v242_v37 }
  0x5a   :  { %v257_v62 = vsel %vm783_vm13, %v254_v5, %v251_v34  ;;  %v269_v61 = vmul.f32 0.6931472, %v458_v24  ;;  %v178_v49 = vsel %vm162_vm11, %v154_v63, %v170_v29  ;;  %v179_v15 = vsel %vm163_vm12, %v155_v20, %v171_v33  ;;  %v986_v33 = vld [vmem:[#allocation32_spill] sm:$0xff] }
  0x5b   :  { %v266_v59 = vsel %vm789_vm14, %v263_v30, %v260_v47  ;;  %vm839_vm15 = vcmp.lt.f32.partialorder %v273_v56, 0.0004427343  ;;  %v276_v10 = vadd.f32 %v212_v44, %v676_v31  ;;  %v277_v8 = vadd.f32 %v221_v3, %v678_v32  ;;  %v979_v31 = vld [vmem:[#allocation30_spill] sm:$0xff]  ;;  %v987_v47 = vld [vmem:[#allocation33_spill] sm:$0xff]  ;;  %v989_v3 = vld [vmem:[#allocation35_spill] sm:$0xff] }
  0x5c   :  { %v278_v21 = vadd.f32 %v230_v4, %v683_v35  ;;  %v279_v16 = vadd.f32 %v239_v6, %v689_v42  ;;  %v280_v45 = vadd.f32 %v248_v48, %v975_v11  ;;  %v849_v12 = vadd.f32 %v257_v62, %v976_v38  ;;  %v980_v32 = vld [vmem:[#allocation18_spill] sm:$0xff] }
  0x5d   :  { %v292_v18 = vmul.f32 %v172_v19, %v977_v60  ;;  %v293_v9 = vmul.f32 %v173_v58, %v978_v39  ;;  %v275_v13 = vsel %vm839_vm15, %v799_v46, %v269_v61  ;;  %v857_v57 = vadd.f32 %v266_v59, %v979_v31  ;;  %v988_v56 = vld [vmem:[#allocation34_spill] sm:$0xff] }
  0x5e   :  { %v294_v35 = vmul.f32 %v174_v27, %v980_v32  ;;  %v295_v42 = vmul.f32 %v175_v40, %v981_v26  ;;  %v284_v23 = vadd.f32 %v172_v19, %v977_v60  ;;  %v296_v25 = vmul.f32 %v176_v2, %v982_v28 }
  0x5f   :  { %v297_v5 = vmul.f32 %v177_v7, %v983_v51  ;;  %v300_v53 = vmul.f32 2.0, %v292_v18  ;;  %v285_v54 = vadd.f32 %v173_v58, %v978_v39  ;;  %v286_v63 = vadd.f32 %v174_v27, %v980_v32  ;;  %v990_v32 = vld [vmem:[#allocation31_spill] sm:$0xff] }
  0x60   :  { %v301_v20 = vmul.f32 2.0, %v293_v9  ;;  %v302_v46 = vmul.f32 2.0, %v294_v35  ;;  %v287_v43 = vadd.f32 %v175_v40, %v981_v26  ;;  %v288_v30 = vadd.f32 %v176_v2, %v982_v28 }
  0x61   :  { %v289_v41 = vadd.f32 %v177_v7, %v983_v51  ;;  %v303_v36 = vmul.f32 2.0, %v295_v42  ;;  %v290_v14 = vadd.f32 %v178_v49, %v984_v50  ;;  %v291_v0 = vadd.f32 %v179_v15, %v985_v22 }
  0x62   :  { %v298_v1 = vmul.f32 %v178_v49, %v984_v50  ;;  %v299_v17 = vmul.f32 %v179_v15, %v985_v22  ;;  %v304_v52 = vmul.f32 2.0, %v296_v25  ;;  %v305_v19 = vmul.f32 2.0, %v297_v5  ;;  %v991_v5 = vld [vmem:[#allocation17_spill] sm:$0xff] }
  0x63   :  { %v308_v37 = vsub.f32 %v284_v23, %v300_v53  ;;  %v320_v34 = vmul.f32 0.5, %v982_v28  ;;  %v309_v24 = vsub.f32 %v285_v54, %v301_v20  ;;  %v310_v29 = vsub.f32 %v286_v63, %v302_v46  ;;  %v992_v53 = vld [vmem:[#allocation19_spill] sm:$0xff]  ;;  %v993_v20 = vld [vmem:[#allocation20_spill] sm:$0xff] }
  0x64   :  { %v324_v58 = vsub.f32 0.75, %v986_v33  ;;  %v325_v27 = vsub.f32 0.75, %v987_v47  ;;  %v311_v40 = vsub.f32 %v287_v43, %v303_v36  ;;  %v321_v2 = vmul.f32 0.5, %v983_v51  ;;  %v996_v43 = vld [vmem:[#allocation11_spill] sm:$0xff]  ;;  %v1001_v33 = vld [vmem:[#allocation14_spill] sm:$0xff] }
  0x65   :  { %v326_v44 = vsub.f32 0.75, %v988_v56  ;;  %v327_v4 = vsub.f32 0.75, %v989_v3  ;;  %v306_v6 = vmul.f32 2.0, %v298_v1  ;;  %v307_v7 = vmul.f32 2.0, %v299_v17  ;;  %v998_v1 = vld [vmem:[#allocation13_spill] sm:$0xff] }
  0x66   :  { %v332_v48 = vmul.f32 %v324_v58, %v276_v10  ;;  %v333_v62 = vmul.f32 %v325_v27, %v277_v8  ;;  %v312_v61 = vsub.f32 %v288_v30, %v304_v52  ;;  %v322_v49 = vmul.f32 0.5, %v984_v50  ;;  %v1000_v52 = vld [vmem:[#allocation22_spill] sm:$0xff] }
  0x67   :  { %v328_v15 = vsub.f32 0.75, %v320_v34  ;;  %v334_v59 = vmul.f32 %v326_v44, %v278_v21  ;;  %v313_v55 = vsub.f32 %v289_v41, %v305_v19  ;;  %v323_v11 = vmul.f32 0.5, %v985_v22  ;;  %v997_v41 = vld [vmem:[#allocation21_spill] sm:$0xff] }
  0x68   :  { %v340_v38 = vmul.f32 %v308_v37, %v308_v37  ;;  %v341_v60 = vmul.f32 %v309_v24, %v309_v24  ;;  %v329_v18 = vsub.f32 0.75, %v321_v2  ;;  %v335_v39 = vmul.f32 %v327_v4, %v279_v16 }
  0x69   :  { %v342_v9 = vmul.f32 %v310_v29, %v310_v29  ;;  %v343_v31 = vmul.f32 %v311_v40, %v311_v40  ;;  %v283_v35 = vadd.f32 %v275_v13, %v990_v32  ;;  %v314_v26 = vsub.f32 %v290_v14, %v306_v6  ;;  %v994_v13 = vld [vmem:[#allocation12_spill] sm:$0xff] }
  0x6a   :  { %v348_v42 = vmul.f32 %v340_v38, %v332_v48  ;;  %v349_v10 = vmul.f32 %v341_v60, %v333_v62  ;;  %v330_v8 = vsub.f32 0.75, %v322_v49  ;;  %v336_v23 = vmul.f32 %v328_v15, %v280_v45 }
  0x6b   :  { %v344_v28 = vmul.f32 %v312_v61, %v312_v61  ;;  %v350_v25 = vmul.f32 %v342_v9, %v334_v59  ;;  %v315_v51 = vsub.f32 %v291_v0, %v307_v7  ;;  %v331_v21 = vsub.f32 0.75, %v323_v11 }
  0x6c   :  { %vm365_vm0 = vcmp.lt.s32.totalorder %v991_v5, 2048  ;;  %vm366_vm1 = vcmp.lt.s32.totalorder %v992_v53, 2048  ;;  %v337_v54 = vmul.f32 %v329_v18, %v849_v12  ;;  %v345_v16 = vmul.f32 %v313_v55, %v313_v55 }
  0x6d   :  { %v351_v63 = vmul.f32 %v343_v31, %v335_v39  ;;  %vm367_vm2 = vcmp.lt.s32.totalorder %v993_v20, 2048  ;;  %v995_v46 = vmul.u32 128, %v994_v13  ;;  %vm368_vm3 = vcmp.lt.s32.totalorder %v997_v41, 2048 }
  0x6e   :  { %v373_v45 = vsel %vm365_vm0, %v348_v42, 0.0  ;;  %v374_v36 = vsel %vm366_vm1, %v349_v10, 0.0  ;;  %v338_v50 = vmul.f32 %v330_v8, %v857_v57  ;;  %v346_v14 = vmul.f32 %v314_v26, %v314_v26 }
  0x6f   :  { %v64_v30 = vadd.s32 %v996_v43, %v995_v46  ;;  %v352_v22 = vmul.f32 %v344_v28, %v336_v23  ;;  %v375_v0 = vsel %vm367_vm2, %v350_v25, 0.0  ;;  %v999_v17 = vmul.u32 128, %v998_v1 }
  0x70   :  { %vm369_vm4 = vcmp.lt.s32.totalorder %v1000_v52, 2048  ;;  %v381_v19 = vadd.f32 %v374_v36, %v373_v45  ;;  %v339_v37 = vmul.f32 %v331_v21, %v283_v35  ;;  %v347_v34 = vmul.f32 %v315_v51, %v315_v51 }
  0x71   :  { %v65_v12 = vadd.s32 %v996_v43, %v999_v17  ;;  %v353_v24 = vmul.f32 %v345_v16, %v337_v54  ;;  %v376_v29 = vsel %vm368_vm3, %v351_v63, 0.0  ;;  %v1002_v58 = vmul.u32 128, %v1001_v33 }
  0x72   :  { %vm370_vm5 = vcmp.lt.s32.totalorder %v64_v30, 2048  ;;  %v382_v57 = vadd.f32 %v381_v19, %v375_v0  ;;  %v354_v27 = vmul.f32 %v346_v14, %v338_v50  ;;  %v377_v40 = vsel %vm369_vm4, %v352_v22, 0.0 }
  0x73   :  { %v66_v47 = vadd.s32 %v996_v43, %v1002_v58  ;;  %vm371_vm6 = vcmp.lt.s32.totalorder %v65_v12, 2048  ;;  %v355_v56 = vmul.f32 %v347_v34, %v339_v37  ;;  %v378_v44 = vsel %vm370_vm5, %v353_v24, 0.0 }
  0x74   :  { %v383_v2 = vadd.f32 %v382_v57, %v376_v29  ;;  %v379_v4 = vsel %vm371_vm6, %v354_v27, 0.0 }
  0x75   :  { %vm372_vm7 = vcmp.lt.s32.totalorder %v66_v47, 2048 }
  0x76   :  { %v384_v3 = vadd.f32 %v383_v2, %v377_v40  ;;  %v380_v7 = vsel %vm372_vm7, %v355_v56, 0.0 }
  0x78   :  { %v385_v6 = vadd.f32 %v384_v3, %v378_v44 }
  0x7a   :  { %v386_v48 = vadd.f32 %v385_v6, %v379_v4 }
  0x7c   :  { %v387_v62 = vadd.f32 %v386_v48, %v380_v7 }
  0x7e   :  { %389 = vst [vmem:[#allocation7] sm:$0xff] %v387_v62 }
  0x7f   :  { %514 = shalt.err (!%p511_p6)
}
  0x80   :  { %s515_s10 = scalar_lea.hbm %s912_s2, 128 }
  0x81   :  { %p516_p7 = scmp.ne.s32.totalorder %s912_s2, %s515_s10  ;;  %p519_p8 = scmp.lt.u32.totalorder %s515_s10, %s912_s2 }
  0x83   :  { %p521_p9 = pnand %p519_p8, %p516_p7 }
  0x85   :  { %524 = shalt.err (!%p521_p9)
}
  0x86   :  { %399 = dma.vmem_to_hbm [thread:$0]  %s397_s6, 128, %s912_s2, [#allocation4]  }
  0x87   :  { %529 = dma.done.wait [#allocation4], 128  }
  0x88   :  { %530 = vsyncadd [#allocation4], 4294967168 }
  0x89   :  { %403 = vsyncpa [#allocation3], 1 }
  0x8a   :  { %404 = vsyncpa [#allocation6], 1 }
  0x8b   :  { %405 = vsyncpa [#allocation4], 1 }

</bundles_post_ra>
